<compile_context>
chip_gen: v7x
topology: tpu7x:2x2x1
jax: 0.10.0
libtpu: 0.0.40
codegen_flags: <defaults>
</compile_context>

<pallas_src>
import functools

import jax
import jax.numpy as jnp
from jax.experimental import pallas as pl
from jax.experimental.pallas import tpu as pltpu


# ---------------------------------------------------------------------------
# Kernels
# ---------------------------------------------------------------------------

def _rmsnorm_kernel(x_ref, w_ref, o_ref, *, eps, fuse_weight_f32):
    # x_ref: (tile_rows, dim), w_ref: (1, dim), o_ref: (tile_rows, dim)
    x = x_ref[...].astype(jnp.float32)                     # x.float()
    ms = jnp.mean(x * x, axis=-1, keepdims=True)           # mean(x^2, -1, keepdim)
    inv = jax.lax.rsqrt(ms + eps)                          # rsqrt -> EUP slot
    if fuse_weight_f32:
        # One cast fewer per element; deviates slightly from PyTorch rounding.
        o_ref[...] = (x * inv * w_ref[...].astype(jnp.float32)).astype(o_ref.dtype)
    else:
        normed = (x * inv).astype(x_ref.dtype)             # .type_as(x)
        o_ref[...] = (normed * w_ref[...]).astype(o_ref.dtype)  # * weight


def _rmsnorm_kernel_packed(x_ref, w_ref, o_ref, *, eps, dim, k, fuse_weight_f32):
    # Lane-dense path for dim < 128: each lane-row packs k original rows, so
    # the stored last dim is k*dim (multiple of 128) and vst is unmasked.
    # x_ref: (tile_rows, k*dim), w_ref: (1, k*dim) (weight tiled k times).
    x = x_ref[...].astype(jnp.float32)
    x2 = x * x
    lane = jax.lax.broadcasted_iota(jnp.int32, x.shape, 1)
    inv = jnp.zeros_like(x)
    for j in range(k):                                      # k <= 16, unrolled
        m = (lane >= j * dim) & (lane < (j + 1) * dim)
        ssj = jnp.sum(jnp.where(m, x2, 0.0), axis=-1, keepdims=True)  # (T, 1)
        invj = jax.lax.rsqrt(ssj * (1.0 / dim) + eps)
        inv = jnp.where(m, invj, inv)
    if fuse_weight_f32:
        o_ref[...] = (x * inv * w_ref[...].astype(jnp.float32)).astype(o_ref.dtype)
    else:
        normed = (x * inv).astype(x_ref.dtype)
        o_ref[...] = (normed * w_ref[...]).astype(o_ref.dtype)


# ---------------------------------------------------------------------------
# Wrapper
# ---------------------------------------------------------------------------

def _sublane_multiple(*dtypes):
    """Packed sublane count: 8 for 32-bit, 16 for 16-bit, 32 for 8-bit."""
    m = 8
    for dt in dtypes:
        m = max(m, 32 // jnp.dtype(dt).itemsize)
    return m


def _tpu_vmem_capacity_bytes():
    """Physical VMEM per core; conservative 64 MiB if the query fails."""
    try:
        info = pltpu.get_tpu_info()
        cap = int(getattr(info, "vmem_capacity_bytes", 0) or 0)
        if cap > 0:
            return cap
    except Exception:
        pass
    return 64 << 20


def rmsnorm(x, weight, eps=1e-6, *, tile_rows=None, vmem_budget_bytes=None,
            fuse_weight_f32=False):
    """RMSNorm over the last axis of x, scaled by `weight` (shape [dim])."""
    orig_shape = x.shape
    dim = orig_shape[-1]
    rows = 1
    for s in orig_shape[:-1]:
        rows *= s

    # PyTorch promotion of (x.dtype after type_as) * weight.dtype
    out_dtype = jnp.promote_types(x.dtype, weight.dtype)
    x_bytes = jnp.dtype(x.dtype).itemsize
    o_bytes = jnp.dtype(out_dtype).itemsize
    sub = _sublane_multiple(x.dtype, out_dtype)

    # ---- lane-dense packing for narrow hidden sizes -----------------------
    k = 1
    if 8 <= dim < 128 and 128 % dim == 0 and rows % (128 // dim) == 0:
        k = 128 // dim
    # TODO(synk): pad rows (single HBM copy) so arbitrary row counts can use
    # the packed path, and handle dim > 128 that is not a multiple of 128.
    rows_eff = rows // k
    dim_eff = dim * k

    x2d = x.reshape(rows_eff, dim_eff)
    if k > 1:
        w2d = jnp.tile(weight.reshape(-1), k).reshape(1, dim_eff)
    else:
        w2d = weight.reshape(1, dim_eff)

    # ---- generation-aware VMEM budget --------------------------------------
    vmem_cap = _tpu_vmem_capacity_bytes()
    small_vmem = vmem_cap <= (64 << 20) + (1 << 20)          # v7x-like (64 MiB/TC)
    if vmem_budget_bytes is None:
        vmem_budget_bytes = (36 << 20) if small_vmem else (80 << 20)
    vmem_limit_cap = (48 << 20) if small_vmem else (100 << 20)

    # Per-element working set: double-buffered in/out DMA blocks plus the
    # single-buffered f32 intermediates (upcast x + one temp) that stay live
    # across the lane-axis mean/rsqrt.
    per_row_bytes = dim_eff * (2 * (x_bytes + o_bytes) + 2 * 4)

    row_cap = 2048  # beyond ~1-2K rows the HBM-roofline fraction is flat
    if tile_rows is None:
        cand = max(sub, min(row_cap, vmem_budget_bytes // max(per_row_bytes, 1)))
        tile_rows = max(sub, (cand // sub) * sub)
    else:
        tile_rows = max(sub, (min(int(tile_rows), row_cap) // sub) * sub)

    if tile_rows >= rows_eff:
        tile_rows = rows_eff  # full-array block (always a legal block shape)
        # v7x-like chips have 2 TensorCores: a 1-step grid leaves one idle.
        # Split into >=4 steps whenever there are enough rows.
        if small_vmem and rows_eff >= 4 * sub:
            t = -(-rows_eff // 4)
            tile_rows = max(sub, ((t + sub - 1) // sub) * sub)

    grid = (pl.cdiv(rows_eff, tile_rows),)

    # Explicit VMEM limit: double-buffered in/out blocks + f32 temps + weight
    # + headroom, capped below physical VMEM (never the full 64 MiB on v7x).
    block_in = tile_rows * dim_eff * x_bytes
    block_out = tile_rows * dim_eff * o_bytes
    f32_tmp = tile_rows * dim_eff * 4 * 2
    w_block = dim_eff * jnp.dtype(weight.dtype).itemsize
    vmem_limit = 2 * (block_in + block_out) + f32_tmp + 2 * w_block + (2 << 20)
    vmem_limit = int(min(max(vmem_limit, 4 << 20), vmem_limit_cap))
    # TODO(synk): for extreme hidden sizes where even a sub-row block exceeds
    # the budget, add a second "arbitrary" grid axis over dim chunks with a
    # VMEM sum-of-squares accumulator (two-pass normalize).

    if k > 1:
        kernel = functools.partial(_rmsnorm_kernel_packed, eps=eps, dim=dim, k=k,
                                   fuse_weight_f32=fuse_weight_f32)
    else:
        kernel = functools.partial(_rmsnorm_kernel, eps=eps,
                                   fuse_weight_f32=fuse_weight_f32)

    out = pl.pallas_call(
        kernel,
        out_shape=jax.ShapeDtypeStruct((rows_eff, dim_eff), out_dtype),
        grid_spec=pltpu.PrefetchScalarGridSpec(
            num_scalar_prefetch=0,
            grid=grid,
            in_specs=[
                pl.BlockSpec((tile_rows, dim_eff), lambda i: (i, 0)),
                pl.BlockSpec((1, dim_eff), lambda i: (0, 0)),
            ],
            out_specs=pl.BlockSpec((tile_rows, dim_eff), lambda i: (i, 0)),
        ),
        compiler_params=pltpu.CompilerParams(
            dimension_semantics=("parallel",),
            vmem_limit_bytes=vmem_limit,
        ),
    )(x2d, w2d)

    return out.reshape(orig_shape)


if __name__ == "__main__":
    # Small shapes consistent with the module: [batch, seq, hidden]
    batch, seq, hidden = 2, 8, 32
    eps = 1e-6

    key = jax.random.PRNGKey(0)
    x = jax.random.normal(key, (batch, seq, hidden), dtype=jnp.float32)

    # Deterministic parameter init (nn.Parameter(torch.ones(dim)))
    weight = jnp.ones((hidden,), dtype=jnp.float32)

    out = rmsnorm(x, weight, eps=eps)
    out = jax.block_until_ready(out)

    # Pure-JAX reference check (mirrors PyTorch forward exactly)
    xf = x.astype(jnp.float32)
    ref = (xf * jax.lax.rsqrt(jnp.mean(xf * xf, axis=-1, keepdims=True) + eps)
           ).astype(x.dtype) * weight
    assert out.shape == ref.shape and out.dtype == ref.dtype
    assert jnp.allclose(out, ref, atol=1e-5, rtol=1e-5)

    print("KERNEL_OK")
</pallas_src>

<mosaic_0001>
module attributes {stable_mosaic.version = 11 : i64} {
  func.func @_rmsnorm_kernel_packed(%arg0: i32, %arg1: memref<4x128xf32, #tpu.memory_space<vmem>>, %arg2: memref<1x128xf32, #tpu.memory_space<vmem>>, %arg3: memref<4x128xf32, #tpu.memory_space<vmem>>) attributes {dimension_semantics = [#tpu.dimension_semantics<parallel>], iteration_bounds = array<i64: 1>, scalar_prefetch = 0 : i64, scratch_operands = 0 : i64, tpu.core_type = #tpu.core_type<tc>, window_params = [{transform_indices = @transform_0, window_bounds = array<i64: 4, 128>}, {pipeline_mode = #tpu.pipeline_mode<synchronous>, transform_indices = @transform_1, window_bounds = array<i64: 1, 128>}, {transform_indices = @transform_2, window_bounds = array<i64: 4, 128>}]} {
    %c0 = arith.constant 0 : index
    %c0_0 = arith.constant 0 : index
    %0 = vector.load %arg1[%c0, %c0_0] : memref<4x128xf32, #tpu.memory_space<vmem>>, vector<4x128xf32>
    %1 = arith.mulf %0, %0 : vector<4x128xf32>
    %2 = tpu.iota {dimensions = array<i32: 1>} : vector<4x128xi32>
    %cst = arith.constant 0.000000e+00 : f32
    %3 = vector.broadcast %cst : f32 to vector<4x128xf32>
    %c0_i32 = arith.constant 0 : i32
    %4 = vector.broadcast %c0_i32 : i32 to vector<4x128xi32>
    %5 = arith.cmpi sge, %2, %4 : vector<4x128xi32>
    %c32_i32 = arith.constant 32 : i32
    %6 = vector.broadcast %c32_i32 : i32 to vector<4x128xi32>
    %7 = arith.cmpi slt, %2, %6 : vector<4x128xi32>
    %8 = arith.andi %5, %7 : vector<4x128xi1>
    %cst_1 = arith.constant 0.000000e+00 : f32
    %9 = vector.broadcast %cst_1 : f32 to vector<4x128xf32>
    %10 = arith.select %8, %1, %9 : vector<4x128xi1>, vector<4x128xf32>
    %cst_2 = arith.constant dense<0.000000e+00> : vector<4xf32>
    %11 = vector.multi_reduction <add>, %10, %cst_2 [1] : vector<4x128xf32> to vector<4xf32>
    %12 = vector.shape_cast %11 : vector<4xf32> to vector<4x1xf32>
    %cst_3 = arith.constant 3.125000e-02 : f32
    %13 = vector.broadcast %cst_3 : f32 to vector<4x1xf32>
    %14 = arith.mulf %12, %13 : vector<4x1xf32>
    %cst_4 = arith.constant 9.99999997E-7 : f32
    %15 = vector.broadcast %cst_4 : f32 to vector<4x1xf32>
    %16 = arith.addf %14, %15 : vector<4x1xf32>
    %17 = math.rsqrt %16 : vector<4x1xf32>
    %18 = vector.shape_cast %17 : vector<4x1xf32> to vector<4x1xf32>
    %19 = vector.broadcast %18 : vector<4x1xf32> to vector<4x128xf32>
    %20 = arith.select %8, %19, %3 : vector<4x128xi1>, vector<4x128xf32>
    %c32_i32_5 = arith.constant 32 : i32
    %21 = vector.broadcast %c32_i32_5 : i32 to vector<4x128xi32>
    %22 = arith.cmpi sge, %2, %21 : vector<4x128xi32>
    %c64_i32 = arith.constant 64 : i32
    %23 = vector.broadcast %c64_i32 : i32 to vector<4x128xi32>
    %24 = arith.cmpi slt, %2, %23 : vector<4x128xi32>
    %25 = arith.andi %22, %24 : vector<4x128xi1>
    %cst_6 = arith.constant 0.000000e+00 : f32
    %26 = vector.broadcast %cst_6 : f32 to vector<4x128xf32>
    %27 = arith.select %25, %1, %26 : vector<4x128xi1>, vector<4x128xf32>
    %cst_7 = arith.constant dense<0.000000e+00> : vector<4xf32>
    %28 = vector.multi_reduction <add>, %27, %cst_7 [1] : vector<4x128xf32> to vector<4xf32>
    %29 = vector.shape_cast %28 : vector<4xf32> to vector<4x1xf32>
    %cst_8 = arith.constant 3.125000e-02 : f32
    %30 = vector.broadcast %cst_8 : f32 to vector<4x1xf32>
    %31 = arith.mulf %29, %30 : vector<4x1xf32>
    %cst_9 = arith.constant 9.99999997E-7 : f32
    %32 = vector.broadcast %cst_9 : f32 to vector<4x1xf32>
    %33 = arith.addf %31, %32 : vector<4x1xf32>
    %34 = math.rsqrt %33 : vector<4x1xf32>
    %35 = vector.shape_cast %34 : vector<4x1xf32> to vector<4x1xf32>
    %36 = vector.broadcast %35 : vector<4x1xf32> to vector<4x128xf32>
    %37 = arith.select %25, %36, %20 : vector<4x128xi1>, vector<4x128xf32>
    %c64_i32_10 = arith.constant 64 : i32
    %38 = vector.broadcast %c64_i32_10 : i32 to vector<4x128xi32>
    %39 = arith.cmpi sge, %2, %38 : vector<4x128xi32>
    %c96_i32 = arith.constant 96 : i32
    %40 = vector.broadcast %c96_i32 : i32 to vector<4x128xi32>
    %41 = arith.cmpi slt, %2, %40 : vector<4x128xi32>
    %42 = arith.andi %39, %41 : vector<4x128xi1>
    %cst_11 = arith.constant 0.000000e+00 : f32
    %43 = vector.broadcast %cst_11 : f32 to vector<4x128xf32>
    %44 = arith.select %42, %1, %43 : vector<4x128xi1>, vector<4x128xf32>
    %cst_12 = arith.constant dense<0.000000e+00> : vector<4xf32>
    %45 = vector.multi_reduction <add>, %44, %cst_12 [1] : vector<4x128xf32> to vector<4xf32>
    %46 = vector.shape_cast %45 : vector<4xf32> to vector<4x1xf32>
    %cst_13 = arith.constant 3.125000e-02 : f32
    %47 = vector.broadcast %cst_13 : f32 to vector<4x1xf32>
    %48 = arith.mulf %46, %47 : vector<4x1xf32>
    %cst_14 = arith.constant 9.99999997E-7 : f32
    %49 = vector.broadcast %cst_14 : f32 to vector<4x1xf32>
    %50 = arith.addf %48, %49 : vector<4x1xf32>
    %51 = math.rsqrt %50 : vector<4x1xf32>
    %52 = vector.shape_cast %51 : vector<4x1xf32> to vector<4x1xf32>
    %53 = vector.broadcast %52 : vector<4x1xf32> to vector<4x128xf32>
    %54 = arith.select %42, %53, %37 : vector<4x128xi1>, vector<4x128xf32>
    %c96_i32_15 = arith.constant 96 : i32
    %55 = vector.broadcast %c96_i32_15 : i32 to vector<4x128xi32>
    %56 = arith.cmpi sge, %2, %55 : vector<4x128xi32>
    %c128_i32 = arith.constant 128 : i32
    %57 = vector.broadcast %c128_i32 : i32 to vector<4x128xi32>
    %58 = arith.cmpi slt, %2, %57 : vector<4x128xi32>
    %59 = arith.andi %56, %58 : vector<4x128xi1>
    %cst_16 = arith.constant 0.000000e+00 : f32
    %60 = vector.broadcast %cst_16 : f32 to vector<4x128xf32>
    %61 = arith.select %59, %1, %60 : vector<4x128xi1>, vector<4x128xf32>
    %cst_17 = arith.constant dense<0.000000e+00> : vector<4xf32>
    %62 = vector.multi_reduction <add>, %61, %cst_17 [1] : vector<4x128xf32> to vector<4xf32>
    %63 = vector.shape_cast %62 : vector<4xf32> to vector<4x1xf32>
    %cst_18 = arith.constant 3.125000e-02 : f32
    %64 = vector.broadcast %cst_18 : f32 to vector<4x1xf32>
    %65 = arith.mulf %63, %64 : vector<4x1xf32>
    %cst_19 = arith.constant 9.99999997E-7 : f32
    %66 = vector.broadcast %cst_19 : f32 to vector<4x1xf32>
    %67 = arith.addf %65, %66 : vector<4x1xf32>
    %68 = math.rsqrt %67 : vector<4x1xf32>
    %69 = vector.shape_cast %68 : vector<4x1xf32> to vector<4x1xf32>
    %70 = vector.broadcast %69 : vector<4x1xf32> to vector<4x128xf32>
    %71 = arith.select %59, %70, %54 : vector<4x128xi1>, vector<4x128xf32>
    %72 = arith.mulf %0, %71 : vector<4x128xf32>
    %c0_20 = arith.constant 0 : index
    %c0_21 = arith.constant 0 : index
    %73 = vector.load %arg2[%c0_20, %c0_21] : memref<1x128xf32, #tpu.memory_space<vmem>>, vector<1x128xf32>
    %74 = vector.broadcast %73 : vector<1x128xf32> to vector<4x128xf32>
    %75 = arith.mulf %72, %74 : vector<4x128xf32>
    %c0_22 = arith.constant 0 : index
    %c0_23 = arith.constant 0 : index
    %76 = vector.load %arg3[%c0_22, %c0_23] : memref<4x128xf32, #tpu.memory_space<vmem>>, vector<4x128xf32>
    tpu.vector_store %arg3[%c0_22, %c0_23], %75 {strides = array<i32>} : memref<4x128xf32, #tpu.memory_space<vmem>>, vector<4x128xf32>,
    return
  }
  func.func @transform_0(%arg0: i32) -> (i32, i32) {
    %c0_i32 = arith.constant 0 : i32
    %c0_i32_0 = arith.constant 0 : i32
    return %arg0, %c0_i32 : i32, i32
  }
  func.func @transform_1(%arg0: i32) -> (i32, i32) {
    %c0_i32 = arith.constant 0 : i32
    %c0_i32_0 = arith.constant 0 : i32
    %c0_i32_1 = arith.constant 0 : i32
    return %c0_i32, %c0_i32_0 : i32, i32
  }
  func.func @transform_2(%arg0: i32) -> (i32, i32) {
    %c0_i32 = arith.constant 0 : i32
    %c0_i32_0 = arith.constant 0 : i32
    return %arg0, %c0_i32 : i32, i32
  }
}

</mosaic_0001>

<bundles_post_ra>
// kernel: tpu_custom_call.1
= control target key start
LH: loop header
LB: loop body
LE: loop exit
PB: predicated region body
PF: predicated region fallthrough
CT: control target
= control target key end

     0   :  { %7 = vsyncpa [#allocation3], 0  ;;  %s221_s0 = inlined_call_operand.hbm [shape: f32[4,128], index: 0, kind: input, shape index: {}]   ;;  %s222_s1 = inlined_call_operand.vmem [shape: f32[1,128], index: 1, kind: input, shape index: {}]   ;;  %s223_s2 = inlined_call_operand.hbm [shape: f32[4,128], index: 2, kind: output, shape index: {}]  }
   0x1   :  { %8 = vsyncpa [#allocation4], 0  ;;  %s157_s9 = smov [#allocation2]   ;;  %s109_s13 = scalar_lea.hbm %s221_s0, 64 }
   0x2   :  { %s15_s10 = sshll.u32 %s157_s9, 4  ;;  %p110_p0 = scmp.ne.s32.totalorder %s221_s0, %s109_s13  ;;  %s16_s10 = int_to_ptr.vmem [resolvable:$true] %s15_s10 }
   0x3   :  { %p113_p1 = scmp.lt.u32.totalorder %s109_s13, %s221_s0 }
   0x5   :  { %p115_p2 = pnand %p113_p1, %p110_p0 }
   0x7   :  { %118 = shalt.err (!%p115_p2)
}
   0x8   :  { %s119_s18 = scalar_lea.vmem %s16_s10, 64  ;;  %p124_p4 = scmp.lt.s32.totalorder %s16_s10, %s16_s10 }
   0x9   :  { %p120_p3 = scmp.ne.s32.totalorder %s16_s10, %s119_s18  ;;  %p125_p5 = scmp.lt.s32.totalorder %s119_s18, %s119_s18 }
   0xb   :  { %p126_p6 = por %p125_p5, %p124_p4 }
   0xd   :  { %p127_p7 = pnand %p126_p6, %p120_p3 }
   0xf   :  { %130 = shalt.err (!%p127_p7)
}
  0x10   :  { %18 = dma.hbm_to_vmem [thread:$0]  %s221_s0, 64, %s16_s10, [#allocation3]  }
  0x11   :  { %153 = dma.done.wait [#allocation3], 64  }
  0x12   :  { %154 = vsyncadd [#allocation3], 4294967232  ;;  %v26_v0 = vlaneseq  ;;  %v24_v3 = vld [vmem:[#allocation2] sm:$0xf]  ;;  %vm32_vm8 = vcmask 1043456   ;;  %s158_s22 = smov [#allocation5]  }
  0x13   :  { %v25_v5 = vmul.f32 %v24_v3, %v24_v3  ;;  %v98_v34 = vld [vmem:[%s222_s1] ss:$0 sm:$0xff]  ;;  %s89_s23 = sshll.u32 %s158_s22, 4  ;;  %s90_s23 = int_to_ptr.vmem [resolvable:$true] %s89_s23 }
  0x14   :  { %v27_v1 = vand.u32 127, %v26_v0  ;;  %s131_s24 = scalar_lea.vmem %s90_s23, 64  ;;  %p136_p9 = scmp.lt.s32.totalorder %s90_s23, %s90_s23 }
  0x15   :  { %p132_p8 = scmp.ne.s32.totalorder %s90_s23, %s131_s24  ;;  %p137_p10 = scmp.lt.s32.totalorder %s131_s24, %s131_s24 }
  0x16   :  { %vm51_vm0 = vcmp.ge.s32.totalorder %v27_v1, 64  ;;  %vm52_vm1 = vcmp.lt.s32.totalorder %v27_v1, 96  ;;  %vm40_vm2 = vcmp.ge.s32.totalorder %v27_v1, 32  ;;  %vm41_vm3 = vcmp.lt.s32.totalorder %v27_v1, 64 }
  0x17   :  { %vm186_vm4 = vmand %vm51_vm0, %vm52_vm1  ;;  %vm29_vm5 = vcmp.lt.s32.totalorder %v27_v1, 32  ;;  %vm62_vm7 = vcmp.ge.s32.totalorder %v27_v1, 96  ;;  %p138_p11 = por %p137_p10, %p136_p9 }
  0x18   :  { %vm190_vm6 = vmand %vm40_vm2, %vm41_vm3  ;;  %v31_v6 = vsel %vm29_vm5, %v25_v5, 0.0  ;;  %v54_v7 = vsel %vm186_vm4, %v25_v5, 0.0  ;;  %v65_v9 = vsel %vm62_vm7, %v25_v5, 0.0 }
  0x19   :  { %v43_v8 = vsel %vm190_vm6, %v25_v5, 0.0  ;;  %v33_v10 = vsel %vm32_vm8, %v31_v6, 0.0  ;;  %v55_v11 = vsel %vm32_vm8, %v54_v7, 0.0  ;;  %v66_v13 = vsel %vm32_vm8, %v65_v9, 0.0  ;;  %p139_p12 = pnand %p138_p11, %p132_p8 }
  0x1a   :  { %34 = vadd.xlane.f32.xlu0 %v33_v10  ;;  %56 = vadd.xlane.f32.xlu1 %v55_v11  ;;  %v44_v12 = vsel %vm32_vm8, %v43_v8, 0.0 }
  0x1e   :  { %45 = vadd.xlane.f32.xlu0 %v44_v12  ;;  %67 = vadd.xlane.f32.xlu1 %v66_v13 }
  0xa7   :  { %v35_v14 = vpop.xlane.xlu0 %34  ;;  %v57_v15 = vpop.xlane.xlu1 %56 }
  0xa8   :  { %v36_v16 = vmul.f32 0.03125, %v35_v14  ;;  %v58_v17 = vmul.f32 0.03125, %v57_v15 }
  0xaa   :  { %v37_v18 = vadd.f32 1e-06, %v36_v16  ;;  %v59_v19 = vadd.f32 1e-06, %v58_v17 }
  0xab   :  { %v46_v20 = vpop.xlane.xlu0 %45  ;;  %v68_v21 = vpop.xlane.xlu1 %67 }
  0xac   :  { %v47_v22 = vmul.f32 0.03125, %v46_v20  ;;  %v69_v23 = vmul.f32 0.03125, %v68_v21  ;;  %101 = vrsqrt.f32 %v37_v18 }
  0xad   :  { %103 = vrsqrt.f32 %v59_v19 }
  0xae   :  { %v48_v24 = vadd.f32 1e-06, %v47_v22  ;;  %v70_v25 = vadd.f32 1e-06, %v69_v23 }
  0xb0   :  { %105 = vrsqrt.f32 %v48_v24 }
  0xb1   :  { %107 = vrsqrt.f32 %v70_v25 }
  0xb6   :  { %v102_v26 = vpop.eup %101 }
  0xb7   :  { %v104_v27 = vpop.eup %103  ;;  %v39_v29 = vsel %vm29_vm5, %v102_v26, 0.0 }
  0xba   :  { %v106_v28 = vpop.eup %105 }
  0xbb   :  { %v108_v30 = vpop.eup %107  ;;  %v50_v31 = vsel %vm190_vm6, %v106_v28, %v39_v29 }
  0xbc   :  { %v61_v32 = vsel %vm186_vm4, %v104_v27, %v50_v31 }
  0xbd   :  { %v72_v33 = vsel %vm62_vm7, %v108_v30, %v61_v32 }
  0xbe   :  { %v73_v35 = vmul.f32 %v72_v33, %v24_v3 }
  0xc0   :  { %v81_v36 = vmul.f32 %v98_v34, %v73_v35 }
  0xc2   :  { %82 = vst [vmem:[#allocation5] sm:$0xf] %v81_v36 }
  0xc3   :  { %142 = shalt.err (!%p139_p12)
}
  0xc4   :  { %s143_s27 = scalar_lea.hbm %s223_s2, 64 }
  0xc5   :  { %p144_p13 = scmp.ne.s32.totalorder %s223_s2, %s143_s27  ;;  %p147_p0 = scmp.lt.u32.totalorder %s143_s27, %s223_s2 }
  0xc7   :  { %p149_p1 = pnand %p147_p0, %p144_p13 }
  0xc9   :  { %152 = shalt.err (!%p149_p1)
}
  0xca   :  { %92 = dma.vmem_to_hbm [thread:$0]  %s90_s23, 64, %s223_s2, [#allocation4]  }
  0xcb   :  { %155 = dma.done.wait [#allocation4], 64  }
  0xcc   :  { %156 = vsyncadd [#allocation4], 4294967232 }
  0xcd   :  { %96 = vsyncpa [#allocation3], 1 }
  0xce   :  { %97 = vsyncpa [#allocation4], 1 }

</bundles_post_ra>
